<compile_context>
chip_gen: v5e
topology: v5e:2x2
jax: 0.10.0
libtpu: 0.0.40
codegen_flags: <defaults>
</compile_context>

<pallas_src>
import jax
import jax.numpy as jnp
from jax.experimental import pallas as pl
from jax.experimental.pallas import tpu as pltpu


def _erf(x):
    # Abramowitz & Stegun 7.1.26 (|err| <= 1.5e-7).  Uses only exp / mul /
    # add / div / select, all of which lower cleanly in Mosaic; exp / recip go
    # to the EUP slot so this is nearly free next to the two matmuls.
    a1, a2, a3, a4, a5 = (0.254829592, -0.284496736, 1.421413741,
                          -1.453152027, 1.061405429)
    p = 0.3275911
    ax = jnp.abs(x)
    t = 1.0 / (1.0 + p * ax)
    poly = t * (a1 + t * (a2 + t * (a3 + t * (a4 + t * a5))))
    y = 1.0 - poly * jnp.exp(-ax * ax)
    return jnp.where(x >= 0, y, -y)


def _gelu_exact(x):
    # Matches torch.nn.GELU() default (erf-based, not the tanh approximation).
    return 0.5 * x * (1.0 + _erf(x * 0.7071067811865476))


def _mlp_kernel(x_ref, w1_ref, b1_ref, w2_ref, b2_ref, o_ref):
    # x: (tm, D)  w1: (D, H)  b1: (1, H)  w2: (H, D)  b2: (1, D)  o: (tm, D)
    # Cast x to the MXU operand dtype in-kernel (no wrapper materialization).
    x = x_ref[...].astype(w1_ref.dtype)

    # First linear: f32 accumulation on the MXU, bias added in f32.
    h = jnp.dot(x, w1_ref[...], preferred_element_type=jnp.float32)
    h = h + b1_ref[...]

    # Exact GELU in f32.
    h = _gelu_exact(h)

    # Second linear: cast the activation back to the MXU operand dtype.
    h = h.astype(w2_ref.dtype)
    y = jnp.dot(h, w2_ref[...], preferred_element_type=jnp.float32)
    y = y + b2_ref[...]

    # Single fused cast + store per tile.
    o_ref[...] = y.astype(o_ref.dtype)


def _round_up(a, b):
    return (a + b - 1) // b * b


def mlp_forward(x, w1, b1, w2, b2, *, block_rows=512, compute_dtype=None,
                vmem_limit_bytes=None):
    """MLP forward: Linear(D,H) -> GELU -> Linear(H,D)  (dropout p=0 -> identity).

    x : (..., D)
    w1: (D, H)   b1: (H,)
    w2: (H, D)   b2: (D,)
    returns an array with the same shape and dtype as x.

    block_rows:    rows per grid step (bigger amortizes per-step overhead;
                   shrink only if W1/W2 + 2 row-tiles overflow VMEM).
    compute_dtype: dtype fed to the MXU (e.g. jnp.bfloat16); accumulation is
                   always f32.
    """
    orig_shape = x.shape
    D = orig_shape[-1]
    H = w1.shape[1]
    out_dtype = x.dtype
    if compute_dtype is None:
        compute_dtype = x.dtype

    M = 1
    for s in orig_shape[:-1]:
        M *= s
    x2 = x.reshape(M, D)  # collapse of leading dims -> free in XLA

    # Row tile: multiple of 8 (sublane), capped at block_rows, padded so the
    # grid divides evenly.  Padded rows are computed and discarded (rows are
    # independent), and only exist for the last tile.
    tm = _round_up(min(block_rows, _round_up(M, 8)), 8)
    M_pad = _round_up(M, tm)
    if M_pad != M:
        x2 = jnp.pad(x2, ((0, M_pad - M), (0, 0)))

    # One-time weight/bias casts (weights are VMEM-resident across the grid).
    w1c = w1.astype(compute_dtype)
    w2c = w2.astype(compute_dtype)
    b1c = b1.reshape(1, H).astype(jnp.float32)
    b2c = b2.reshape(1, D).astype(jnp.float32)

    cp_kwargs = dict(dimension_semantics=("parallel",))  # 2x on v7x (2 TCs)
    if vmem_limit_bytes is not None:
        cp_kwargs["vmem_limit_bytes"] = vmem_limit_bytes

    grid = (M_pad // tm,)
    out = pl.pallas_call(
        _mlp_kernel,
        out_shape=jax.ShapeDtypeStruct((M_pad, D), out_dtype),
        grid=grid,
        in_specs=[
            pl.BlockSpec((tm, D), lambda i: (i, 0)),   # x tile: pipelined over M
            pl.BlockSpec((D, H), lambda i: (0, 0)),    # W1: VMEM-resident
            pl.BlockSpec((1, H), lambda i: (0, 0)),    # b1: VMEM-resident
            pl.BlockSpec((H, D), lambda i: (0, 0)),    # W2: VMEM-resident
            pl.BlockSpec((1, D), lambda i: (0, 0)),    # b2: VMEM-resident
        ],
        out_specs=pl.BlockSpec((tm, D), lambda i: (i, 0)),
        compiler_params=pltpu.CompilerParams(**cp_kwargs),
    )(x2, w1c, b1c, w2c, b2c)

    if M_pad != M:
        out = out[:M]
    return out.reshape(orig_shape)


if __name__ == "__main__":
    # Small shapes consistent with the module: batch=2, seq=8,
    # embed_dim=32, hidden_dim=64.
    B, S, D, Hd = 2, 8, 32, 64

    key = jax.random.PRNGKey(0)
    kx, k1, k2, k3, k4 = jax.random.split(key, 5)
    x = jax.random.normal(kx, (B, S, D), dtype=jnp.float32)
    w1 = jax.random.normal(k1, (D, Hd), dtype=jnp.float32) * 0.05
    b1 = jax.random.normal(k2, (Hd,), dtype=jnp.float32) * 0.05
    w2 = jax.random.normal(k3, (Hd, D), dtype=jnp.float32) * 0.05
    b2 = jax.random.normal(k4, (D,), dtype=jnp.float32) * 0.05

    # f32 compute path (block_rows=8 -> grid of 2 steps at this toy size, so
    # the pipelined multi-tile path is exercised).
    out = jax.block_until_ready(mlp_forward(x, w1, b1, w2, b2, block_rows=8))

    # Pure-JAX reference (exact GELU, high-precision matmuls).
    h_ref = jnp.dot(x.reshape(-1, D), w1,
                    precision=jax.lax.Precision.HIGHEST) + b1
    h_ref = jax.nn.gelu(h_ref, approximate=False)
    ref = (jnp.dot(h_ref, w2, precision=jax.lax.Precision.HIGHEST)
           + b2).reshape(B, S, D)

    assert out.shape == (B, S, D), out.shape
    assert jnp.allclose(out, ref, atol=5e-3, rtol=5e-3), (
        float(jnp.max(jnp.abs(out - ref))))

    # Default (single-tile) path too.
    out_full = jax.block_until_ready(mlp_forward(x, w1, b1, w2, b2))
    assert jnp.allclose(out_full, ref, atol=5e-3, rtol=5e-3), (
        float(jnp.max(jnp.abs(out_full - ref))))

    # bf16 MXU-operand path: f32 accumulation, so the only extra error is the
    # operand quantization -> looser tolerance.
    out_bf16 = jax.block_until_ready(
        mlp_forward(x, w1, b1, w2, b2, block_rows=8,
                    compute_dtype=jnp.bfloat16))
    assert jnp.allclose(out_bf16, ref, atol=5e-2, rtol=5e-2), (
        float(jnp.max(jnp.abs(out_bf16 - ref))))

    print("KERNEL_OK")
</pallas_src>

<mosaic_0001>
module attributes {stable_mosaic.version = 11 : i64} {
  func.func @_mlp_kernel(%arg0: i32, %arg1: memref<8x32xf32, #tpu.memory_space<vmem>>, %arg2: memref<32x64xf32, #tpu.memory_space<vmem>>, %arg3: memref<1x64xf32, #tpu.memory_space<vmem>>, %arg4: memref<64x32xf32, #tpu.memory_space<vmem>>, %arg5: memref<1x32xf32, #tpu.memory_space<vmem>>, %arg6: memref<8x32xf32, #tpu.memory_space<vmem>>) attributes {dimension_semantics = [#tpu.dimension_semantics<parallel>], iteration_bounds = array<i64: 2>, scalar_prefetch = 0 : i64, scratch_operands = 0 : i64, tpu.core_type = #tpu.core_type<tc>, window_params = [{transform_indices = @transform_0, window_bounds = array<i64: 8, 32>}, {pipeline_mode = #tpu.pipeline_mode<synchronous>, transform_indices = @transform_1, window_bounds = array<i64: 32, 64>}, {pipeline_mode = #tpu.pipeline_mode<synchronous>, transform_indices = @transform_2, window_bounds = array<i64: 1, 64>}, {pipeline_mode = #tpu.pipeline_mode<synchronous>, transform_indices = @transform_3, window_bounds = array<i64: 64, 32>}, {pipeline_mode = #tpu.pipeline_mode<synchronous>, transform_indices = @transform_4, window_bounds = array<i64: 1, 32>}, {transform_indices = @transform_5, window_bounds = array<i64: 8, 32>}]} {
    %c0 = arith.constant 0 : index
    %c0_0 = arith.constant 0 : index
    %0 = vector.load %arg1[%c0, %c0_0] : memref<8x32xf32, #tpu.memory_space<vmem>>, vector<8x32xf32>
    %c0_1 = arith.constant 0 : index
    %c0_2 = arith.constant 0 : index
    %1 = vector.load %arg2[%c0_1, %c0_2] : memref<32x64xf32, #tpu.memory_space<vmem>>, vector<32x64xf32>
    %cst = arith.constant dense<0.000000e+00> : vector<8x64xf32>
    %2 = tpu.matmul %0, %1, %cst {dimension_numbers = #tpu.dot_dimension_numbers<[1], [0], [0], [1], [0, 0, 1, 1], [], []>} : vector<8x32xf32>, vector<32x64xf32>, vector<8x64xf32> -> vector<8x64xf32>
    %c0_3 = arith.constant 0 : index
    %c0_4 = arith.constant 0 : index
    %3 = vector.load %arg3[%c0_3, %c0_4] : memref<1x64xf32, #tpu.memory_space<vmem>>, vector<1x64xf32>
    %4 = vector.broadcast %3 : vector<1x64xf32> to vector<8x64xf32>
    %5 = arith.addf %2, %4 : vector<8x64xf32>
    %cst_5 = arith.constant 5.000000e-01 : f32
    %6 = vector.broadcast %cst_5 : f32 to vector<8x64xf32>
    %7 = arith.mulf %6, %5 : vector<8x64xf32>
    %cst_6 = arith.constant 0.707106769 : f32
    %8 = vector.broadcast %cst_6 : f32 to vector<8x64xf32>
    %9 = arith.mulf %5, %8 : vector<8x64xf32>
    %10 = math.absf %9 : vector<8x64xf32>
    %cst_7 = arith.constant 0.327591091 : f32
    %11 = vector.broadcast %cst_7 : f32 to vector<8x64xf32>
    %12 = arith.mulf %11, %10 : vector<8x64xf32>
    %cst_8 = arith.constant 1.000000e+00 : f32
    %13 = vector.broadcast %cst_8 : f32 to vector<8x64xf32>
    %14 = arith.addf %13, %12 : vector<8x64xf32>
    %cst_9 = arith.constant 1.000000e+00 : f32
    %15 = vector.broadcast %cst_9 : f32 to vector<8x64xf32>
    %16 = arith.divf %15, %14 : vector<8x64xf32>
    %cst_10 = arith.constant 1.06140542 : f32
    %17 = vector.broadcast %cst_10 : f32 to vector<8x64xf32>
    %18 = arith.mulf %16, %17 : vector<8x64xf32>
    %cst_11 = arith.constant -1.45315206 : f32
    %19 = vector.broadcast %cst_11 : f32 to vector<8x64xf32>
    %20 = arith.addf %19, %18 : vector<8x64xf32>
    %21 = arith.mulf %16, %20 : vector<8x64xf32>
    %cst_12 = arith.constant 1.42141378 : f32
    %22 = vector.broadcast %cst_12 : f32 to vector<8x64xf32>
    %23 = arith.addf %22, %21 : vector<8x64xf32>
    %24 = arith.mulf %16, %23 : vector<8x64xf32>
    %cst_13 = arith.constant -0.284496725 : f32
    %25 = vector.broadcast %cst_13 : f32 to vector<8x64xf32>
    %26 = arith.addf %25, %24 : vector<8x64xf32>
    %27 = arith.mulf %16, %26 : vector<8x64xf32>
    %cst_14 = arith.constant 0.254829586 : f32
    %28 = vector.broadcast %cst_14 : f32 to vector<8x64xf32>
    %29 = arith.addf %28, %27 : vector<8x64xf32>
    %30 = arith.mulf %16, %29 : vector<8x64xf32>
    %cst_15 = arith.constant 0.000000e+00 : f32
    %31 = vector.broadcast %cst_15 : f32 to vector<8x64xf32>
    %32 = arith.subf %31, %10 : vector<8x64xf32>
    %33 = arith.mulf %32, %10 : vector<8x64xf32>
    %34 = math.exp %33 : vector<8x64xf32>
    %35 = arith.mulf %30, %34 : vector<8x64xf32>
    %cst_16 = arith.constant 1.000000e+00 : f32
    %36 = vector.broadcast %cst_16 : f32 to vector<8x64xf32>
    %37 = arith.subf %36, %35 : vector<8x64xf32>
    %cst_17 = arith.constant 0.000000e+00 : f32
    %38 = vector.broadcast %cst_17 : f32 to vector<8x64xf32>
    %39 = arith.cmpf oge, %9, %38 : vector<8x64xf32>
    %cst_18 = arith.constant 0.000000e+00 : f32
    %40 = vector.broadcast %cst_18 : f32 to vector<8x64xf32>
    %41 = arith.subf %40, %37 : vector<8x64xf32>
    %42 = arith.select %39, %37, %41 : vector<8x64xi1>, vector<8x64xf32>
    %cst_19 = arith.constant 1.000000e+00 : f32
    %43 = vector.broadcast %cst_19 : f32 to vector<8x64xf32>
    %44 = arith.addf %43, %42 : vector<8x64xf32>
    %45 = arith.mulf %7, %44 : vector<8x64xf32>
    %c0_20 = arith.constant 0 : index
    %c0_21 = arith.constant 0 : index
    %46 = vector.load %arg4[%c0_20, %c0_21] : memref<64x32xf32, #tpu.memory_space<vmem>>, vector<64x32xf32>
    %cst_22 = arith.constant dense<0.000000e+00> : vector<8x32xf32>
    %47 = tpu.matmul %45, %46, %cst_22 {dimension_numbers = #tpu.dot_dimension_numbers<[1], [0], [0], [1], [0, 0, 1, 1], [], []>} : vector<8x64xf32>, vector<64x32xf32>, vector<8x32xf32> -> vector<8x32xf32>
    %c0_23 = arith.constant 0 : index
    %c0_24 = arith.constant 0 : index
    %48 = vector.load %arg5[%c0_23, %c0_24] : memref<1x32xf32, #tpu.memory_space<vmem>>, vector<1x32xf32>
    %49 = vector.broadcast %48 : vector<1x32xf32> to vector<8x32xf32>
    %50 = arith.addf %47, %49 : vector<8x32xf32>
    %c0_25 = arith.constant 0 : index
    %c0_26 = arith.constant 0 : index
    %51 = vector.load %arg6[%c0_25, %c0_26] : memref<8x32xf32, #tpu.memory_space<vmem>>, vector<8x32xf32>
    tpu.vector_store %arg6[%c0_25, %c0_26], %50 {strides = array<i32>} : memref<8x32xf32, #tpu.memory_space<vmem>>, vector<8x32xf32>,
    return
  }
  func.func @transform_0(%arg0: i32) -> (i32, i32) {
    %c0_i32 = arith.constant 0 : i32
    %c0_i32_0 = arith.constant 0 : i32
    return %arg0, %c0_i32 : i32, i32
  }
  func.func @transform_1(%arg0: i32) -> (i32, i32) {
    %c0_i32 = arith.constant 0 : i32
    %c0_i32_0 = arith.constant 0 : i32
    %c0_i32_1 = arith.constant 0 : i32
    return %c0_i32, %c0_i32_0 : i32, i32
  }
  func.func @transform_2(%arg0: i32) -> (i32, i32) {
    %c0_i32 = arith.constant 0 : i32
    %c0_i32_0 = arith.constant 0 : i32
    %c0_i32_1 = arith.constant 0 : i32
    return %c0_i32, %c0_i32_0 : i32, i32
  }
  func.func @transform_3(%arg0: i32) -> (i32, i32) {
    %c0_i32 = arith.constant 0 : i32
    %c0_i32_0 = arith.constant 0 : i32
    %c0_i32_1 = arith.constant 0 : i32
    return %c0_i32, %c0_i32_0 : i32, i32
  }
  func.func @transform_4(%arg0: i32) -> (i32, i32) {
    %c0_i32 = arith.constant 0 : i32
    %c0_i32_0 = arith.constant 0 : i32
    %c0_i32_1 = arith.constant 0 : i32
    return %c0_i32, %c0_i32_0 : i32, i32
  }
  func.func @transform_5(%arg0: i32) -> (i32, i32) {
    %c0_i32 = arith.constant 0 : i32
    %c0_i32_0 = arith.constant 0 : i32
    return %arg0, %c0_i32 : i32, i32
  }
}

</mosaic_0001>

<bundles_post_ra>
// kernel: tpu_custom_call.1
= control target key start
LH: loop header
LB: loop body
LE: loop exit
PB: predicated region body
PF: predicated region fallthrough
CT: control target
= control target key end

     0   :  { %10 = vsyncpa [#allocation3], 0  ;;  %s685_s0 = inlined_call_operand.vmem [shape: f32[16,32], index: 0, kind: input, shape index: {}]   ;;  %s686_s1 = inlined_call_operand.vmem [shape: f32[32,64], index: 1, kind: input, shape index: {}]   ;;  %s687_s2 = inlined_call_operand.vmem [shape: f32[1,64], index: 2, kind: input, shape index: {}]   ;;  %s688_s3 = inlined_call_operand.vmem [shape: f32[64,32], index: 3, kind: input, shape index: {}]   ;;  %s689_s4 = inlined_call_operand.vmem [shape: f32[1,32], index: 4, kind: input, shape index: {}]   ;;  %s690_s5 = inlined_call_operand.hbm [shape: f32[16,32], index: 5, kind: output, shape index: {}]  }
   0x1   :  { %12 = vsyncpa [#allocation3 + $0x1], 0  ;;  %s556_s18 = smov 0   ;;  %s558_s19 = smov 0  }
   0x2   :  { %s560_s20 = smov 0   ;;  %s562_s21 = smov 0  }
   0x3 LB: > { %s577_s22 = sadd.s32 4294967295, %s524_s21   ;;  %s405_s23 = sadd.s32 4294967294, %s524_s21   ;;  %s524_s21 = sphi %s562_s21, %s696_s21   ;;  %s520_s20 = sphi %s560_s20, %s695_s20   ;;  %s516_s19 = sphi %s558_s19, %s694_s19   ;;  %s512_s18 = sphi %s556_s18, %s693_s18  }
   0x4   : > { %s581_s24 = sadd.s32 1, %s524_s21   ;;  %s135_s25 = sadd.s32 1, %s520_s20 }
   0x5   : > { %s132_s26 = ssub.s32 %s524_s21, %s581_s24  ;;  %p145_p0 = scmp.ne.s32.totalorder %s520_s20, %s516_s19 }
   0x6   : > { %p133_p1 = scmp.eq.s32.totalorder %s132_s26, 0  ;;  %p146_p2 = scmp.eq.s32.totalorder %s577_s22, 1 }
   0x7   : > { %p151_p3 = scmp.ne.s32.totalorder %s516_s19, %s512_s18  ;;  %p152_p4 = scmp.eq.s32.totalorder %s405_s23, 1 }
   0x8   : > { %s592_s27 = scalar_select %p133_p1, %s520_s20, %s135_s25  }
   0x9   : > { %p594_p5 = por %p146_p2, %p145_p0  ;;  %p598_p6 = por %p152_p4, %p151_p3 }
   0xa   : > { %p408_p7 = scmp.ge.s32.totalorder %s524_s21, 1  ;;  %p189_p8 = scmp.lt.s32.totalorder %s524_s21, 3 }
   0xc   : > { %p190_p9 = pnand %p408_p7, %p189_p8 }
   0xd   : > { %p216_p10 = scmp.lt.s32.totalorder (!%p190_p9), %s577_s22, 1  ;;  %s213_s26 = sand.u32 (!%p190_p9), 1, %s516_s19  }
   0xe   : > { %193 = sbr.rel (%p190_p9) target bundleno = 340 (0x154), region = 40  ;;  %s409_s30 = sshll.u32 (!%p190_p9), %s213_s26, 3 }
   0xf   : > { %s414_s6 = sshll.u32 (!%p190_p9), %s577_s22, 3  ;;  %s215_s12 = scalar_lea.vmem (!%p190_p9), [#allocation2], %s409_s30 }
  0x10   : > { %s341_s9 = scalar_lea.hbm (!%p190_p9), %s690_s5, %s414_s6  ;;  %s343_s13 = sshll.u32 (!%p190_p9), %s215_s12, 4  ;;  %s344_s13 = int_to_ptr.vmem [resolvable:$true] %s343_s13 }
  0x11   : > { %s331_s15 = scalar_lea.sflag (!%p190_p9), [#allocation3], %s213_s26  ;;  %s482_s25 = scalar_lea.hbm (!%p190_p9), %s690_s5, 16 }
  0x13   : > { %v224_v0 = vld [vmem:[%s686_s1 + $0x18] sm:$0xff]  ;;  %v223_v1 = vld [vmem:[%s686_s1 + $0x10] sm:$0xff]  ;;  %v222_v2 = vld [vmem:[%s686_s1 + $0x8] sm:$0xff]  ;;  %s217_s11 = scalar_select %p216_p10, %s577_s22, 1  ;;  %vm229_vm0 = vcmask 261120   ;;  %vm305_vm6 = vcmask 523264  }
  0x14   : > { %245 = vmatpush.msra.mxu0 %v224_v0  ;;  %v221_v3 = vld [vmem:[%s686_s1] sm:$0xff]  ;;  %v300_v5 = vld [vmem:[%s688_s3 + $0x38] sm:$0xff]  ;;  %v299_v6 = vld [vmem:[%s688_s3 + $0x30] sm:$0xff] }
  0x15   : > { %s410_s14 = sshll.u32 %s217_s11, 3  ;;  %317 = vmatpush.msra.mxu1 %v300_v5  ;;  %v298_v7 = vld [vmem:[%s688_s3 + $0x28] sm:$0xff]  ;;  %v297_v8 = vld [vmem:[%s688_s3 + $0x20] sm:$0xff]  ;;  %v296_v9 = vld [vmem:[%s688_s3 + $0x18] sm:$0xff] }
  0x16   : > { %246 = vmatpush.msra.mxu0 %v223_v1  ;;  %s219_s17 = scalar_lea.vmem %s685_s0, %s410_s14  ;;  %v456_v10 = vld [vmem:[%s687_s2] ss:$0 sm:$0xff]  ;;  %v295_v11 = vld [vmem:[%s688_s3 + $0x10] sm:$0xff]  ;;  %v294_v13 = vld [vmem:[%s688_s3 + $0x8] sm:$0xff]  ;;  %s345_s14 = sshll.u32 %s341_s9, 4  ;;  %s346_s14 = int_to_ptr.hbm [resolvable:$true] %s345_s14 }
  0x17   : > { %v220_v4 = vld [vmem:[%s219_s17] sm:$0xff]  ;;  %318 = vmatpush.msra.mxu1 %v299_v6  ;;  %s476_s22 = sshra.s32 %s346_s14, 4  ;;  %s477_s22 = int_to_ptr.hbm [resolvable:$true] %s476_s22 }
  0x18   : > { %247 = vmatpush.msra.mxu0 %v222_v2  ;;  %v293_v15 = vld [vmem:[%s688_s3] sm:$0xff]  ;;  %s478_s16 = scalar_lea.hbm %s477_s22, 8  ;;  %p483_p0 = scmp.lt.s32.totalorder %s477_s22, %s690_s5 }
  0x19   : > { %319 = vmatpush.msra.mxu1 %v298_v7  ;;  %v457_v50 = vld [vmem:[%s689_s4] ss:$0 sm:$0xff]  ;;  %p479_p11 = scmp.ne.s32.totalorder %s477_s22, %s478_s16  ;;  %p484_p1 = scmp.lt.s32.totalorder %s482_s25, %s478_s16 }
  0x1a   : > { %248 = vmatpush.msra.mxu0 %v221_v3 }
  0x1b   : > { %411 = vmatmul.msk.f32.vlgmr.msra.gmra.mxu0 %vm229_vm0, %v220_v4  ;;  %320 = vmatpush.msra.mxu1 %v297_v8  ;;  %p480_p12 = pnand %p479_p11, %p594_p5  ;;  %p485_p2 = por %p484_p1, %p483_p0 }
  0x1d   : > { %321 = vmatpush.msra.mxu1 %v296_v9  ;;  %p481_p13 = pneg %p480_p12 }
  0x1f   : > { %322 = vmatpush.msra.mxu1 %v295_v11  ;;  %p486_p3 = pnand %p485_p2, %p481_p13 }
  0x21   : > { %323 = vmatpush.msra.mxu1 %v294_v13 }
  0x23   : > { %324 = vmatpush.msra.mxu1 %v293_v15 }
  0x98   : > { %v250_v12 = vpop.f32.mrf.mxu0 }
  0x99   : > { %v251_v14 = vadd.f32 %v456_v10, %v250_v12 }
  0x9b   : > { %v254_v16 = vmul.f32 0.70710677, %v251_v14  ;;  %v253_v47 = vmul.f32 0.5, %v251_v14 }
  0x9d   : > { %v255_v17 = vand.u32 2147483647, %v254_v16  ;;  %vm288_vm5 = vcmp.ge.f32.partialorder %v254_v16, 0.0 }
  0x9f   : > { %v256_v18 = vmul.f32 0.3275911, %v255_v17  ;;  %v282_v29 = vsub.f32 0.0, %v255_v17 }
  0xa1   : > { %v257_v19 = vadd.f32 1.0, %v256_v18  ;;  %v283_v33 = vmul.f32 %v282_v29, %v255_v17 }
  0xa3   : > { %458 = vrcp.f32 %v257_v19  ;;  %v269_v23 = vand.u32 2147483648, %v257_v19  ;;  %v267_v25 = vand.u32 2147483647, %v257_v19  ;;  %vm263_vm2 = vweird.f32 %v257_v19 }
  0xa4   : > { %v284_v36 = vmul.f32 1.442695, %v283_v33 }
  0xa5   : > { %v270_v27 = vor.u32 1.1754944e-38, %v269_v23  ;;  %vm268_vm4 = vcmp.eq.f32.partialorder %v267_v25, 8.507059e+37 }
  0xa6   : > { %460 = vpow2.f32 %v284_v36 }
  0xa9   : > { %v459_v20 = vpop.eup %458 }
  0xaa   : > { %v259_v21 = vmul.f32 %v459_v20, %v257_v19  ;;  %vm264_vm1 = vweird.f32 %v459_v20 }
  0xab   : > { %vm265_vm3 = vmor %vm263_vm2, %vm264_vm1 }
  0xac   : > { %v260_v22 = vsub.f32 1.0, %v259_v21  ;;  %v461_v42 = vpop.eup %460 }
  0xae   : > { %v261_v24 = vmul.f32 %v459_v20, %v260_v22 }
  0xb0   : > { %v262_v26 = vadd.f32 %v459_v20, %v261_v24 }
  0xb2   : > { %v266_v28 = vsel %vm265_vm3, %v459_v20, %v262_v26 }
  0xb3   : > { %v271_v30 = vsel %vm268_vm4, %v270_v27, %v266_v28 }
  0xb4   : > { %v273_v31 = vmul.f32 1.0614054, %v271_v30 }
  0xb6   : > { %v274_v32 = vadd.f32 -1.4531521, %v273_v31 }
  0xb8   : > { %v275_v34 = vmul.f32 %v274_v32, %v271_v30 }
  0xba   : > { %v276_v35 = vadd.f32 1.4214138, %v275_v34 }
  0xbc   : > { %v277_v37 = vmul.f32 %v276_v35, %v271_v30 }
  0xbe   : > { %v278_v38 = vadd.f32 -0.28449672, %v277_v37 }
  0xc0   : > { %v279_v39 = vmul.f32 %v278_v38, %v271_v30 }
  0xc2   : > { %v280_v40 = vadd.f32 0.2548296, %v279_v39 }
  0xc4   : > { %v281_v41 = vmul.f32 %v280_v40, %v271_v30 }
  0xc6   : > { %v286_v43 = vmul.f32 %v461_v42, %v281_v41 }
  0xc8   : > { %v287_v44 = vsub.f32 1.0, %v286_v43 }
  0xca   : > { %v289_v45 = vsub.f32 0.0, %v287_v44 }
  0xcc   : > { %v290_v46 = vsel %vm288_vm5, %v287_v44, %v289_v45 }
  0xcd   : > { %v291_v48 = vadd.f32 1.0, %v290_v46 }
  0xcf   : > { %v292_v49 = vmul.f32 %v291_v48, %v253_v47 }
  0xd1   : > { %412 = vmatmul.msk.f32.vlgmr.msra.gmra.mxu1 %vm305_vm6, %v292_v49 }
 0x14e   : > { %v326_v51 = vpop.f32.mrf.mxu1 }
 0x14f   : > { %v327_v52 = vadd.f32 %v457_v50, %v326_v51 }
 0x151   : > { %329 = vst.msk [vmem:[%s215_s12] sm:$0xff] %vm229_vm0, %v327_v52 }
 0x152   : > { %489 = shalt.err (!%p486_p3)
}
 0x153   : > { %417 = dma.vmem_to_hbm [thread:$0]  (%p594_p5), %s344_s13, 128, %s346_s14, %s331_s15  }
 0x154 PF: > { %p423_p4 = scmp.ge.s32.totalorder %s524_s21, 2  ;;  %s357_s26 = sand.u32 1, %s512_s18  }
 0x155   : > { %s358_s7 = scalar_lea.sflag [#allocation3], %s357_s26 }
 0x156   : > { %p420_p7 = pnand %p423_p4, %p598_p6 }
 0x158   : > { %p421_p8 = pneg %p420_p7 }
 0x15a   : > { %507 = dma.done.wait (%p421_p8), %s358_s7, 128  }
 0x15b   : > { %509 = vsyncadd (%p421_p8), %s358_s7, 4294967168  ;;  %p15_p9 = scmp.ge.s32.totalorder %s581_s24, 4   ;;  %s693_s18 = smov %s516_s19 }
 0x15c   : > { %s694_s19 = smov %s520_s20  ;;  %s695_s20 = smov %s592_s27 }
 0x15d   : > { %s696_s21 = smov %s581_s24  ;;  %17 = sbr.rel (!%p15_p9) target bundleno = 3 (0x3), region = 75 }
 0x162   :  { %364 = vsyncpa [#allocation3], 1 }
 0x163   :  { %366 = vsyncpa [#allocation3 + $0x1], 1 }

</bundles_post_ra>
